<compile_context>
chip_gen: v7x
topology: tpu7x:2x2x1
jax: 0.10.0
libtpu: 0.0.40
codegen_flags: <defaults>
</compile_context>

<pallas_src>
import jax
import jax.numpy as jnp
from jax.experimental import pallas as pl
from jax.experimental.pallas import tpu as pltpu

IN_F = 784
HID_F = 256
OUT_F = 10

N_PAD = 128     # 10 rounded up to 128 -> lane-dense, unmasked output stores
TB_MAX = 1024   # max batch tile (MXU-aligned, fits scoped VMEM on all gens)


def _round_up(x, m):
    return (x + m - 1) // m * m


def mlp_kernel(x_ref, w1_ref, b1_ref, w2_ref, b2_ref, o_ref):
    # hidden = relu(x @ W1 + b1): cast x tile to bf16 on the VPU, bf16 MXU
    # matmul, f32 accumulate + epilogue.
    x = x_ref[...].astype(jnp.bfloat16)                       # (TB, 784)
    h = jnp.dot(x, w1_ref[...], preferred_element_type=jnp.float32)
    h = jnp.maximum(h + b1_ref[...], 0.0)                     # (TB, 256) f32
    # out = hidden @ W2 + b2: bf16 MXU matmul, f32 accumulate, bf16 store.
    out = jnp.dot(h.astype(jnp.bfloat16), w2_ref[...],
                  preferred_element_type=jnp.float32)         # (TB, 128)
    o_ref[...] = (out + b2_ref[...]).astype(o_ref.dtype)


def mlp_forward(x, w1, b1, w2, b2):
    """x: (B, 784) f32; w1: (784, 256); b1: (256,); w2: (256, 10); b2: (10,)."""
    B = x.shape[0]

    # Batch tile: multiple of 16 (bf16 sublane packing). If the whole batch
    # would fit in one tile, split it ~in half so v7x's 2 TCs both get work.
    TB = min(TB_MAX, _round_up(max(pl.cdiv(B, 2), 1), 16))
    if TB >= B:                       # single tile anyway -> exact-fit tile
        TB = _round_up(B, 8)
    grid = (pl.cdiv(B, TB),)

    # --- tiny resident operands: cast / lane-pad (zero pad keeps math exact)
    w1b = w1.astype(jnp.bfloat16)                                   # (784, 256)
    b1p = b1.astype(jnp.float32).reshape(1, HID_F)                  # (1, 256)
    w2p = jnp.zeros((HID_F, N_PAD), jnp.bfloat16).at[:, :OUT_F].set(
        w2.astype(jnp.bfloat16))                                    # (256, 128)
    b2p = jnp.zeros((1, N_PAD), jnp.float32).at[0, :OUT_F].set(
        b2.astype(jnp.float32))                                     # (1, 128)

    flops = 2 * B * (IN_F * HID_F + HID_F * N_PAD)
    bytes_accessed = (B * IN_F * 4                 # x stream (f32)
                      + IN_F * HID_F * 2 + HID_F * 4
                      + HID_F * N_PAD * 2 + N_PAD * 4
                      + B * N_PAD * 2)             # bf16 output slab

    out = pl.pallas_call(
        mlp_kernel,
        out_shape=jax.ShapeDtypeStruct((B, N_PAD), jnp.bfloat16),
        grid_spec=pltpu.PrefetchScalarGridSpec(
            num_scalar_prefetch=0,
            grid=grid,
            in_specs=[
                pl.BlockSpec((TB, IN_F), lambda i: (i, 0)),      # x tile (f32)
                pl.BlockSpec((IN_F, HID_F), lambda i: (0, 0)),   # W1 resident
                pl.BlockSpec((1, HID_F), lambda i: (0, 0)),      # b1 resident
                pl.BlockSpec((HID_F, N_PAD), lambda i: (0, 0)),  # W2 resident
                pl.BlockSpec((1, N_PAD), lambda i: (0, 0)),      # b2 resident
            ],
            out_specs=pl.BlockSpec((TB, N_PAD), lambda i: (i, 0)),
        ),
        compiler_params=pltpu.CompilerParams(
            dimension_semantics=("parallel",),
            vmem_limit_bytes=32 * 1024 * 1024),
        cost_estimate=pl.CostEstimate(flops=flops, transcendentals=0,
                                      bytes_accessed=bytes_accessed),
    )(x, w1b, b1p, w2p, b2p)

    # Slice away the lane padding; return f32 logits like the PyTorch module.
    return out[:, :OUT_F].astype(jnp.float32)


def init_params(key):
    # Mimics nn.Linear's U(-1/sqrt(in), 1/sqrt(in)) init (weights pre-transposed).
    k1, k2, k3, k4 = jax.random.split(key, 4)
    lim1 = 1.0 / jnp.sqrt(float(IN_F))
    lim2 = 1.0 / jnp.sqrt(float(HID_F))
    w1 = jax.random.uniform(k1, (IN_F, HID_F), jnp.float32, -lim1, lim1)
    b1 = jax.random.uniform(k2, (HID_F,), jnp.float32, -lim1, lim1)
    w2 = jax.random.uniform(k3, (HID_F, OUT_F), jnp.float32, -lim2, lim2)
    b2 = jax.random.uniform(k4, (OUT_F,), jnp.float32, -lim2, lim2)
    return w1, b1, w2, b2


if __name__ == "__main__":
    key = jax.random.PRNGKey(0)
    kx, kp = jax.random.split(key)
    batch = 8
    x = jax.random.normal(kx, (batch, IN_F), jnp.float32)
    w1, b1, w2, b2 = init_params(kp)

    out = jax.block_until_ready(mlp_forward(x, w1, b1, w2, b2))

    # Reference (same math as the PyTorch forward), f32.
    ref = jnp.maximum(x @ w1 + b1, 0.0) @ w2 + b2
    assert out.shape == (batch, OUT_F)
    # bf16 matmul inputs / bf16 output -> loosened tolerance vs f32 reference.
    assert jnp.allclose(out, ref, atol=5e-2, rtol=5e-2), (
        float(jnp.max(jnp.abs(out - ref))))

    print("KERNEL_OK")
</pallas_src>

<mosaic_0001>
module attributes {stable_mosaic.version = 11 : i64} {
  func.func @mlp_kernel(%arg0: i32, %arg1: memref<8x784xf32, #tpu.memory_space<vmem>>, %arg2: memref<784x256xbf16, #tpu.memory_space<vmem>>, %arg3: memref<1x256xf32, #tpu.memory_space<vmem>>, %arg4: memref<256x128xbf16, #tpu.memory_space<vmem>>, %arg5: memref<1x128xf32, #tpu.memory_space<vmem>>, %arg6: memref<8x128xbf16, #tpu.memory_space<vmem>>) attributes {dimension_semantics = [#tpu.dimension_semantics<parallel>], iteration_bounds = array<i64: 1>, scalar_prefetch = 0 : i64, scratch_operands = 0 : i64, tpu.core_type = #tpu.core_type<tc>, window_params = [{transform_indices = @transform_0, window_bounds = array<i64: 8, 784>}, {pipeline_mode = #tpu.pipeline_mode<synchronous>, transform_indices = @transform_1, window_bounds = array<i64: 784, 256>}, {pipeline_mode = #tpu.pipeline_mode<synchronous>, transform_indices = @transform_2, window_bounds = array<i64: 1, 256>}, {pipeline_mode = #tpu.pipeline_mode<synchronous>, transform_indices = @transform_3, window_bounds = array<i64: 256, 128>}, {pipeline_mode = #tpu.pipeline_mode<synchronous>, transform_indices = @transform_4, window_bounds = array<i64: 1, 128>}, {transform_indices = @transform_5, window_bounds = array<i64: 8, 128>}]} {
    %c0 = arith.constant 0 : index
    %c0_0 = arith.constant 0 : index
    %0 = vector.load %arg1[%c0, %c0_0] : memref<8x784xf32, #tpu.memory_space<vmem>>, vector<8x784xf32>
    %1 = arith.truncf %0 : vector<8x784xf32> to vector<8x784xbf16>
    %c0_1 = arith.constant 0 : index
    %c0_2 = arith.constant 0 : index
    %2 = vector.load %arg2[%c0_1, %c0_2] : memref<784x256xbf16, #tpu.memory_space<vmem>>, vector<784x256xbf16>
    %cst = arith.constant dense<0.000000e+00> : vector<8x256xf32>
    %3 = tpu.matmul %1, %2, %cst {dimension_numbers = #tpu.dot_dimension_numbers<[1], [0], [0], [1], [0, 0, 1, 1], [], []>} : vector<8x784xbf16>, vector<784x256xbf16>, vector<8x256xf32> -> vector<8x256xf32>
    %c0_3 = arith.constant 0 : index
    %c0_4 = arith.constant 0 : index
    %4 = vector.load %arg3[%c0_3, %c0_4] : memref<1x256xf32, #tpu.memory_space<vmem>>, vector<1x256xf32>
    %5 = vector.broadcast %4 : vector<1x256xf32> to vector<8x256xf32>
    %6 = arith.addf %3, %5 : vector<8x256xf32>
    %cst_5 = arith.constant 0.000000e+00 : f32
    %7 = vector.broadcast %cst_5 : f32 to vector<8x256xf32>
    %8 = arith.maximumf %6, %7 : vector<8x256xf32>
    %9 = arith.truncf %8 : vector<8x256xf32> to vector<8x256xbf16>
    %c0_6 = arith.constant 0 : index
    %c0_7 = arith.constant 0 : index
    %10 = vector.load %arg4[%c0_6, %c0_7] : memref<256x128xbf16, #tpu.memory_space<vmem>>, vector<256x128xbf16>
    %cst_8 = arith.constant dense<0.000000e+00> : vector<8x128xf32>
    %11 = tpu.matmul %9, %10, %cst_8 {dimension_numbers = #tpu.dot_dimension_numbers<[1], [0], [0], [1], [0, 0, 1, 1], [], []>} : vector<8x256xbf16>, vector<256x128xbf16>, vector<8x128xf32> -> vector<8x128xf32>
    %c0_9 = arith.constant 0 : index
    %c0_10 = arith.constant 0 : index
    %12 = vector.load %arg5[%c0_9, %c0_10] : memref<1x128xf32, #tpu.memory_space<vmem>>, vector<1x128xf32>
    %13 = vector.broadcast %12 : vector<1x128xf32> to vector<8x128xf32>
    %14 = arith.addf %11, %13 : vector<8x128xf32>
    %15 = arith.truncf %14 : vector<8x128xf32> to vector<8x128xbf16>
    %c0_11 = arith.constant 0 : index
    %c0_12 = arith.constant 0 : index
    %16 = vector.load %arg6[%c0_11, %c0_12] : memref<8x128xbf16, #tpu.memory_space<vmem>>, vector<8x128xbf16>
    tpu.vector_store %arg6[%c0_11, %c0_12], %15 {strides = array<i32>} : memref<8x128xbf16, #tpu.memory_space<vmem>>, vector<8x128xbf16>,
    return
  }
  func.func @transform_0(%arg0: i32) -> (i32, i32) {
    %c0_i32 = arith.constant 0 : i32
    %c0_i32_0 = arith.constant 0 : i32
    return %arg0, %c0_i32 : i32, i32
  }
  func.func @transform_1(%arg0: i32) -> (i32, i32) {
    %c0_i32 = arith.constant 0 : i32
    %c0_i32_0 = arith.constant 0 : i32
    %c0_i32_1 = arith.constant 0 : i32
    return %c0_i32, %c0_i32_0 : i32, i32
  }
  func.func @transform_2(%arg0: i32) -> (i32, i32) {
    %c0_i32 = arith.constant 0 : i32
    %c0_i32_0 = arith.constant 0 : i32
    %c0_i32_1 = arith.constant 0 : i32
    return %c0_i32, %c0_i32_0 : i32, i32
  }
  func.func @transform_3(%arg0: i32) -> (i32, i32) {
    %c0_i32 = arith.constant 0 : i32
    %c0_i32_0 = arith.constant 0 : i32
    %c0_i32_1 = arith.constant 0 : i32
    return %c0_i32, %c0_i32_0 : i32, i32
  }
  func.func @transform_4(%arg0: i32) -> (i32, i32) {
    %c0_i32 = arith.constant 0 : i32
    %c0_i32_0 = arith.constant 0 : i32
    %c0_i32_1 = arith.constant 0 : i32
    return %c0_i32, %c0_i32_0 : i32, i32
  }
  func.func @transform_5(%arg0: i32) -> (i32, i32) {
    %c0_i32 = arith.constant 0 : i32
    %c0_i32_0 = arith.constant 0 : i32
    return %arg0, %c0_i32 : i32, i32
  }
}

</mosaic_0001>

<bundles_post_ra>
// kernel: tpu_custom_call.1
= control target key start
LH: loop header
LB: loop body
LE: loop exit
PB: predicated region body
PF: predicated region fallthrough
CT: control target
= control target key end

     0   :  { %10 = vsyncpa [#allocation3], 0  ;;  %s1547_s0 = inlined_call_operand.hbm [shape: f32[8,784], index: 0, kind: input, shape index: {}]   ;;  %s1548_s1 = inlined_call_operand.hbm [shape: bf16[784,256], index: 1, kind: input, shape index: {}]   ;;  %s1549_s2 = inlined_call_operand.vmem [shape: f32[1,256], index: 2, kind: input, shape index: {}]   ;;  %s1550_s3 = inlined_call_operand.hbm [shape: bf16[256,128], index: 3, kind: input, shape index: {}]   ;;  %s1551_s4 = inlined_call_operand.vmem [shape: f32[1,128], index: 4, kind: input, shape index: {}]   ;;  %s1552_s5 = inlined_call_operand.hbm [shape: bf16[8,128], index: 5, kind: output, shape index: {}]  }
   0x1   :  { %11 = vsyncpa [#allocation6], 0 }
   0x2   :  { %12 = vsyncpa [#allocation4], 0  ;;  %s1454_s18 = smov [#allocation5]   ;;  %s1360_s22 = scalar_lea.hbm %s1548_s1, 12544 }
   0x3   :  { %s28_s19 = sshll.u32 %s1454_s18, 4  ;;  %p1361_p0 = scmp.ne.s32.totalorder %s1548_s1, %s1360_s22  ;;  %s29_s19 = int_to_ptr.vmem [resolvable:$true] %s28_s19 }
   0x4   :  { %p1364_p1 = scmp.lt.u32.totalorder %s1360_s22, %s1548_s1 }
   0x6   :  { %p1366_p2 = pnand %p1364_p1, %p1361_p0 }
   0x8   :  { %1369 = shalt.err (!%p1366_p2)
}
   0x9   :  { %s1370_s27 = scalar_lea.vmem %s29_s19, 12544  ;;  %p1375_p4 = scmp.lt.s32.totalorder %s29_s19, %s29_s19 }
   0xa   :  { %p1371_p3 = scmp.ne.s32.totalorder %s29_s19, %s1370_s27  ;;  %p1376_p5 = scmp.lt.s32.totalorder %s1370_s27, %s1370_s27 }
   0xc   :  { %p1377_p6 = por %p1376_p5, %p1375_p4 }
   0xe   :  { %p1378_p7 = pnand %p1377_p6, %p1371_p3 }
  0x10   :  { %1381 = shalt.err (!%p1378_p7)
}
  0x11   :  { %s1455_s28 = smov 128   ;;  %s1456_s29 = smov 8  }
  0x12   :  { %34 = dma.hbm_to_vmem [thread:$0]  %s1548_s1, 12544, %s29_s19, [#allocation6], %s1455_s28, %s1455_s28, %s1456_s29  }
  0x13   :  { %s1457_s7 = smov [#allocation2]   ;;  %s1458_s9 = smov [#allocation7]  }
  0x14   :  { %s19_s8 = sshll.u32 %s1457_s7, 4  ;;  %s42_s10 = sshll.u32 %s1458_s9, 4  ;;  %s20_s8 = int_to_ptr.vmem [resolvable:$true] %s19_s8  ;;  %s43_s10 = int_to_ptr.vmem [resolvable:$true] %s42_s10 }
  0x15   :  { %s1382_s13 = scalar_lea.hbm %s1547_s0, 896 }
  0x16   :  { %p1383_p8 = scmp.ne.s32.totalorder %s1547_s0, %s1382_s13  ;;  %p1386_p9 = scmp.lt.u32.totalorder %s1382_s13, %s1547_s0 }
  0x18   :  { %p1388_p10 = pnand %p1386_p9, %p1383_p8 }
  0x1a   :  { %1391 = shalt.err (!%p1388_p10)
}
  0x1b   :  { %s1392_s1 = scalar_lea.vmem %s20_s8, 896  ;;  %p1397_p12 = scmp.lt.s32.totalorder %s20_s8, %s20_s8 }
  0x1c   :  { %p1393_p11 = scmp.ne.s32.totalorder %s20_s8, %s1392_s1  ;;  %p1398_p13 = scmp.lt.s32.totalorder %s1392_s1, %s1392_s1 }
  0x1e   :  { %p1399_p0 = por %p1398_p13, %p1397_p12 }
  0x20   :  { %p1400_p1 = pnand %p1399_p0, %p1393_p11 }
  0x22   :  { %1403 = shalt.err (!%p1400_p1)
}
  0x23   :  { %22 = dma.hbm_to_vmem [thread:$0]  %s1547_s0, 896, %s20_s8, [#allocation3]  }
  0x24   :  { %s1404_s22 = scalar_lea.hbm %s1550_s3, 2048 }
  0x25   :  { %p1405_p2 = scmp.ne.s32.totalorder %s1550_s3, %s1404_s22  ;;  %p1408_p3 = scmp.lt.u32.totalorder %s1404_s22, %s1550_s3 }
  0x27   :  { %p1410_p4 = pnand %p1408_p3, %p1405_p2 }
  0x29   :  { %1413 = shalt.err (!%p1410_p4)
}
  0x2a   :  { %s1414_s27 = scalar_lea.vmem %s43_s10, 2048  ;;  %p1419_p6 = scmp.lt.s32.totalorder %s43_s10, %s43_s10 }
  0x2b   :  { %p1415_p5 = scmp.ne.s32.totalorder %s43_s10, %s1414_s27  ;;  %p1420_p7 = scmp.lt.s32.totalorder %s1414_s27, %s1414_s27 }
  0x2d   :  { %p1421_p8 = por %p1420_p7, %p1419_p6 }
  0x2f   :  { %p1422_p9 = pnand %p1421_p8, %p1415_p5 }
  0x31   :  { %1425 = shalt.err (!%p1422_p9)
}
  0x32   :  { %s1459_s0 = smov 64   ;;  %s1460_s28 = smov 4  }
  0x33   :  { %48 = dma.hbm_to_vmem [thread:$0]  %s1550_s3, 2048, %s43_s10, [#allocation6], %s1459_s0, %s1459_s0, %s1460_s28  }
  0x34   :  { %1448 = dma.done.wait [#allocation3], 896  }
  0x35   :  { %1449 = vsyncadd [#allocation3], 4294966400 }
  0x36   :  { %1450 = dma.done.wait [#allocation6], 14592  }
  0x37   :  { %1451 = vsyncadd [#allocation6], 4294952704  ;;  %v1197_v0 = vld [vmem:[#allocation5 + $0x104] ss:$8 sps:$4 sm:$0xff]   ;;  %v1199_v1 = vld [vmem:[#allocation5 + $0x100] ss:$8 sps:$4 sm:$0xff]  }
  0x38   :  { %720 = vmatprep.subr.bf16.mxu0 %v1197_v0  ;;  %v1200_v2 = vld [vmem:[#allocation5 + $0x114] ss:$8 sps:$4 sm:$0xff]   ;;  %v1202_v3 = vld [vmem:[#allocation5 + $0x110] ss:$8 sps:$4 sm:$0xff]   ;;  %v1203_v4 = vld [vmem:[#allocation5 + $0x124] ss:$8 sps:$4 sm:$0xff]  }
  0x39   :  { %721 = vmatpush1.bf16.msra.mxu0 %v1199_v1  ;;  %v1205_v5 = vld [vmem:[#allocation5 + $0x120] ss:$8 sps:$4 sm:$0xff]   ;;  %v1206_v6 = vld [vmem:[#allocation5 + $0x134] ss:$8 sps:$4 sm:$0xff]   ;;  %v1208_v7 = vld [vmem:[#allocation5 + $0x130] ss:$8 sps:$4 sm:$0xff]  }
  0x3a   :  { %722 = vmatprep.subr.bf16.mxu0 %v1200_v2  ;;  %v1209_v8 = vld [vmem:[#allocation5 + $0x144] ss:$8 sps:$4 sm:$0xff]   ;;  %v1211_v9 = vld [vmem:[#allocation5 + $0x140] ss:$8 sps:$4 sm:$0xff]   ;;  %v1212_v10 = vld [vmem:[#allocation5 + $0x154] ss:$8 sps:$4 sm:$0xff]  }
  0x3b   :  { %v1214_v11 = vld [vmem:[#allocation5 + $0x150] ss:$8 sps:$4 sm:$0xff]   ;;  %v1239_v12 = vld [vmem:[#allocation5 + $0x4] ss:$8 sps:$4 sm:$0xff]   ;;  %v1241_v13 = vld [vmem:[#allocation5] ss:$8 sps:$4 sm:$0xff]  }
  0x3c   :  { %v1215_v14 = vld [vmem:[#allocation5 + $0x164] ss:$8 sps:$4 sm:$0xff]   ;;  %679 = vmatprep.subr.bf16.mxu1 %v1239_v12  ;;  %v1245_v15 = vld [vmem:[#allocation5 + $0x14] ss:$8 sps:$4 sm:$0xff]   ;;  %v1247_v16 = vld [vmem:[#allocation5 + $0x10] ss:$8 sps:$4 sm:$0xff]  }
  0x3d   :  { %723 = vmatpush1.bf16.msra.mxu0 %v1202_v3  ;;  %680 = vmatpush1.bf16.msra.mxu1 %v1241_v13  ;;  %v1217_v17 = vld [vmem:[#allocation5 + $0x160] ss:$8 sps:$4 sm:$0xff]   ;;  %v1218_v18 = vld [vmem:[#allocation5 + $0x174] ss:$8 sps:$4 sm:$0xff]   ;;  %v1251_v19 = vld [vmem:[#allocation5 + $0x24] ss:$8 sps:$4 sm:$0xff]  }
  0x3e   :  { %724 = vmatprep.subr.bf16.mxu0 %v1203_v4  ;;  %681 = vmatprep.subr.bf16.mxu1 %v1245_v15  ;;  %v64_v20 = vld [vmem:[#allocation2 + $0x18] sm:$0xff]  ;;  %v1220_v23 = vld [vmem:[#allocation5 + $0x170] ss:$8 sps:$4 sm:$0xff]   ;;  %v1257_v25 = vld [vmem:[#allocation5 + $0x34] ss:$8 sps:$4 sm:$0xff]   ;;  %vm675_vm0 = vcmask 130048  }
  0x3f   :  { %v1253_v21 = vld [vmem:[#allocation5 + $0x20] ss:$8 sps:$4 sm:$0xff]   ;;  %v71_v22 = vpack.c.bf16 %v64_v20, %v64_v20  ;;  %v1221_v24 = vld [vmem:[#allocation5 + $0x184] ss:$8 sps:$4 sm:$0xff]   ;;  %v1259_v27 = vld [vmem:[#allocation5 + $0x30] ss:$8 sps:$4 sm:$0xff]  }
  0x40   :  { %v1223_v26 = vld [vmem:[#allocation5 + $0x180] ss:$8 sps:$4 sm:$0xff]   ;;  %v1263_v28 = vld [vmem:[#allocation5 + $0x44] ss:$8 sps:$4 sm:$0xff]   ;;  %v1224_v29 = vld [vmem:[#allocation5 + $0x194] ss:$8 sps:$4 sm:$0xff]  }
  0x41   :  { %725 = vmatpush1.bf16.msra.mxu0 %v1205_v5  ;;  %682 = vmatpush1.bf16.msra.mxu1 %v1247_v16  ;;  %v1226_v30 = vld [vmem:[#allocation5 + $0x190] ss:$8 sps:$4 sm:$0xff]   ;;  %v1265_v31 = vld [vmem:[#allocation5 + $0x40] ss:$8 sps:$4 sm:$0xff]   ;;  %v1269_v32 = vld [vmem:[#allocation5 + $0x54] ss:$8 sps:$4 sm:$0xff]  }
  0x42   :  { %726 = vmatprep.subr.bf16.mxu0 %v1206_v6  ;;  %683 = vmatprep.subr.bf16.mxu1 %v1251_v19  ;;  %v1227_v33 = vld [vmem:[#allocation5 + $0x1a4] ss:$8 sps:$4 sm:$0xff]   ;;  %v1229_v34 = vld [vmem:[#allocation5 + $0x1a0] ss:$8 sps:$4 sm:$0xff]   ;;  %v1271_v35 = vld [vmem:[#allocation5 + $0x50] ss:$8 sps:$4 sm:$0xff]  }
  0x43   :  { %752 = vmatprep.mubr.bf16.mxu0 %v71_v22  ;;  %v1275_v36 = vld [vmem:[#allocation5 + $0x64] ss:$8 sps:$4 sm:$0xff]   ;;  %v1230_v37 = vld [vmem:[#allocation5 + $0x1b4] ss:$8 sps:$4 sm:$0xff]   ;;  %v1232_v38 = vld [vmem:[#allocation5 + $0x1b0] ss:$8 sps:$4 sm:$0xff]  }
  0x44   :  { %v1277_v39 = vld [vmem:[#allocation5 + $0x60] ss:$8 sps:$4 sm:$0xff]   ;;  %v1281_v40 = vld [vmem:[#allocation5 + $0x74] ss:$8 sps:$4 sm:$0xff]   ;;  %v1233_v41 = vld [vmem:[#allocation5 + $0x1c4] ss:$8 sps:$4 sm:$0xff]  }
  0x45   :  { %727 = vmatpush1.bf16.msra.mxu0 %v1208_v7  ;;  %684 = vmatpush1.bf16.msra.mxu1 %v1253_v21  ;;  %v1235_v42 = vld [vmem:[#allocation5 + $0x1c0] ss:$8 sps:$4 sm:$0xff]   ;;  %v1283_v43 = vld [vmem:[#allocation5 + $0x70] ss:$8 sps:$4 sm:$0xff]   ;;  %v1287_v44 = vld [vmem:[#allocation5 + $0x84] ss:$8 sps:$4 sm:$0xff]  }
  0x46   :  { %728 = vmatprep.subr.bf16.mxu0 %v1209_v8  ;;  %685 = vmatprep.subr.bf16.mxu1 %v1257_v25  ;;  %v1236_v45 = vld [vmem:[#allocation5 + $0x1d4] ss:$8 sps:$4 sm:$0xff]   ;;  %v1238_v46 = vld [vmem:[#allocation5 + $0x1d0] ss:$8 sps:$4 sm:$0xff]   ;;  %v1289_v47 = vld [vmem:[#allocation5 + $0x80] ss:$8 sps:$4 sm:$0xff]  }
  0x47   :  { %v1293_v48 = vld [vmem:[#allocation5 + $0x94] ss:$8 sps:$4 sm:$0xff]   ;;  %v1242_v49 = vld [vmem:[#allocation5 + $0x1e4] ss:$8 sps:$4 sm:$0xff]   ;;  %v1244_v50 = vld [vmem:[#allocation5 + $0x1e0] ss:$8 sps:$4 sm:$0xff]  }
  0x48   :  { %v1295_v51 = vld [vmem:[#allocation5 + $0x90] ss:$8 sps:$4 sm:$0xff]   ;;  %v1299_v52 = vld [vmem:[#allocation5 + $0xa4] ss:$8 sps:$4 sm:$0xff]   ;;  %v1248_v53 = vld [vmem:[#allocation5 + $0x1f4] ss:$8 sps:$4 sm:$0xff]  }
  0x49   :  { %729 = vmatpush1.bf16.msra.mxu0 %v1211_v9  ;;  %686 = vmatpush1.bf16.msra.mxu1 %v1259_v27  ;;  %v1250_v54 = vld [vmem:[#allocation5 + $0x1f0] ss:$8 sps:$4 sm:$0xff]   ;;  %v1301_v56 = vld [vmem:[#allocation5 + $0xa0] ss:$8 sps:$4 sm:$0xff]   ;;  %v1305_v57 = vld [vmem:[#allocation5 + $0xb4] ss:$8 sps:$4 sm:$0xff]  }
  0x4a   :  { %730 = vmatprep.subr.bf16.mxu0 %v1212_v10  ;;  %687 = vmatprep.subr.bf16.mxu1 %v1263_v28  ;;  %v63_v55 = vld [vmem:[#allocation2 + $0x10] sm:$0xff]  ;;  %v1256_v58 = vld [vmem:[#allocation5 + $0x204] ss:$8 sps:$4 sm:$0xff]   ;;  %v62_v61 = vld [vmem:[#allocation2 + $0x8] sm:$0xff]  ;;  %s1462_s8 = smov [#allocation8]  }
  0x4b   :  { %v70_v59 = vpack.c.bf16 %v63_v55, %v63_v55  ;;  %v1307_v60 = vld [vmem:[#allocation5 + $0xb0] ss:$8 sps:$4 sm:$0xff]   ;;  %v1254_v62 = vld [vmem:[#allocation5 + $0x200] ss:$8 sps:$4 sm:$0xff]   ;;  %v1311_v63 = vld [vmem:[#allocation5 + $0xc4] ss:$8 sps:$4 sm:$0xff]   ;;  %v69_v0 = vpack.c.bf16 %v62_v61, %v62_v61 }
  0x4c   :  { %v1262_v1 = vld [vmem:[#allocation5 + $0x214] ss:$8 sps:$4 sm:$0xff]   ;;  %v1313_v2 = vld [vmem:[#allocation5 + $0xc0] ss:$8 sps:$4 sm:$0xff]   ;;  %v1260_v4 = vld [vmem:[#allocation5 + $0x210] ss:$8 sps:$4 sm:$0xff]  }
  0x4d   :  { %731 = vmatpush1.bf16.msra.mxu0 %v1214_v11  ;;  %688 = vmatpush1.bf16.msra.mxu1 %v1265_v31  ;;  %v66_v3 = vld [vmem:[#allocation2 + $0x28] sm:$0xff]  ;;  %v1268_v7 = vld [vmem:[#allocation5 + $0x224] ss:$8 sps:$4 sm:$0xff]   ;;  %v1266_v8 = vld [vmem:[#allocation5 + $0x220] ss:$8 sps:$4 sm:$0xff]   ;;  %s1030_s9 = sshll.u32 %s1462_s8, 4  ;;  %s1031_s9 = int_to_ptr.vmem [resolvable:$true] %s1030_s9 }
  0x4e   :  { %732 = vmatprep.subr.bf16.mxu0 %v1215_v14  ;;  %689 = vmatprep.subr.bf16.mxu1 %v1269_v32  ;;  %v1317_v5 = vld [vmem:[#allocation5 + $0xd4] ss:$8 sps:$4 sm:$0xff]   ;;  %v73_v6 = vpack.c.bf16 %v66_v3, %v66_v3  ;;  %v1319_v9 = vld [vmem:[#allocation5 + $0xd0] ss:$8 sps:$4 sm:$0xff]   ;;  %v1323_v10 = vld [vmem:[#allocation5 + $0xe4] ss:$8 sps:$4 sm:$0xff]   ;;  %p1431_p11 = scmp.lt.s32.totalorder %s1031_s9, %s1031_s9 }
  0x4f   :  { %711 = vmatprep.mubr.bf16.mxu1 %v69_v0  ;;  %v1274_v11 = vld [vmem:[#allocation5 + $0x234] ss:$8 sps:$4 sm:$0xff]   ;;  %v1272_v12 = vld [vmem:[#allocation5 + $0x230] ss:$8 sps:$4 sm:$0xff]   ;;  %v1325_v13 = vld [vmem:[#allocation5 + $0xe0] ss:$8 sps:$4 sm:$0xff]  }
  0x50   :  { %v1329_v14 = vld [vmem:[#allocation5 + $0xf4] ss:$8 sps:$4 sm:$0xff]   ;;  %v1280_v15 = vld [vmem:[#allocation5 + $0x244] ss:$8 sps:$4 sm:$0xff]   ;;  %v1331_v16 = vld [vmem:[#allocation5 + $0xf0] ss:$8 sps:$4 sm:$0xff]  }
  0x51   :  { %733 = vmatpush1.bf16.msra.mxu0 %v1217_v17  ;;  %690 = vmatpush1.bf16.msra.mxu1 %v1271_v35  ;;  %v61_v17 = vld [vmem:[#allocation2] sm:$0xff]  ;;  %v1286_v20 = vld [vmem:[#allocation5 + $0x254] ss:$8 sps:$4 sm:$0xff]   ;;  %v1296_v32 = vld [vmem:[#allocation5 + $0x270] ss:$8 sps:$4 sm:$0xff]   ;;  %s1426_s10 = scalar_lea.vmem %s1031_s9, 64 }
  0x52   :  { %734 = vmatprep.subr.bf16.mxu0 %v1218_v18  ;;  %691 = vmatprep.subr.bf16.mxu1 %v1275_v36  ;;  %v1278_v18 = vld [vmem:[#allocation5 + $0x240] ss:$8 sps:$4 sm:$0xff]   ;;  %v1340_v19 = vld [vmem:[#allocation5 + $0x304] ss:$8 sps:$4 sm:$0xff]   ;;  %v68_v21 = vpack.c.bf16 %v61_v17, %v61_v17  ;;  %v67_v27 = vld [vmem:[#allocation2 + $0x30] sm:$0xff]  ;;  %p1427_p10 = scmp.ne.s32.totalorder %s1031_s9, %s1426_s10  ;;  %p1432_p12 = scmp.lt.s32.totalorder %s1426_s10, %s1426_s10 }
  0x53   :  { %v1338_v22 = vld [vmem:[#allocation5 + $0x300] ss:$8 sps:$4 sm:$0xff]   ;;  %v1292_v25 = vld [vmem:[#allocation5 + $0x264] ss:$8 sps:$4 sm:$0xff]   ;;  %v1345_v31 = vld [vmem:[#allocation7] sm:$0xff]  }
  0x54   :  { %v1290_v28 = vld [vmem:[#allocation5 + $0x260] ss:$8 sps:$4 sm:$0xff]   ;;  %v1347_v35 = vld [vmem:[#allocation7 + $0x8] sm:$0xff]   ;;  %p1433_p13 = por %p1432_p12, %p1431_p11 }
  0x55   :  { %735 = vmatpush1.bf16.msra.mxu0 %v1220_v23  ;;  %692 = vmatpush1.bf16.msra.mxu1 %v1277_v39  ;;  %v1284_v23 = vld [vmem:[#allocation5 + $0x250] ss:$8 sps:$4 sm:$0xff]   ;;  %v1302_v36 = vld [vmem:[#allocation5 + $0x280] ss:$8 sps:$4 sm:$0xff]  }
  0x56   :  { %736 = vmatprep.subr.bf16.mxu0 %v1221_v24  ;;  %693 = vmatprep.subr.bf16.mxu1 %v1281_v40  ;;  %v1344_v24 = vld [vmem:[#allocation7 + $0x40] sm:$0xff]   ;;  %v1349_v39 = vld [vmem:[#allocation7 + $0x10] sm:$0xff]   ;;  %v1350_v55 = vld [vmem:[#allocation7 + $0x58] sm:$0xff]   ;;  %p1434_p0 = pnand %p1433_p13, %p1427_p10 }
  0x57   :  { %v1308_v40 = vld [vmem:[#allocation5 + $0x290] ss:$8 sps:$4 sm:$0xff]   ;;  %v1356_v61 = vld [vmem:[#allocation7 + $0x70] sm:$0xff]   ;;  %v1359_v0 = vld [vmem:[#allocation7 + $0x38] sm:$0xff]  }
  0x59   :  { %737 = vmatpush1.bf16.msra.mxu0 %v1223_v26  ;;  %694 = vmatpush1.bf16.msra.mxu1 %v1283_v43  ;;  %v1461_v26 = vmov 0   ;;  %v1322_v43 = vld [vmem:[#allocation5 + $0x2b4] ss:$8 sps:$4 sm:$0xff]  }
  0x5a   :  { %738 = vmatprep.subr.bf16.mxu0 %v1224_v29  ;;  %695 = vmatprep.subr.bf16.mxu1 %v1287_v44  ;;  %v1298_v29 = vld [vmem:[#allocation5 + $0x274] ss:$8 sps:$4 sm:$0xff]   ;;  %v1320_v44 = vld [vmem:[#allocation5 + $0x2b0] ss:$8 sps:$4 sm:$0xff]  }
  0x5d   :  { %739 = vmatpush1.bf16.msra.mxu0 %v1226_v30  ;;  %696 = vmatpush1.bf16.msra.mxu1 %v1289_v47  ;;  %v74_v30 = vpack.c.bf16 %v67_v27, %v67_v27  ;;  %v1334_v47 = vld [vmem:[#allocation5 + $0x2d4] ss:$8 sps:$4 sm:$0xff]  }
  0x5e   :  { %740 = vmatprep.subr.bf16.mxu0 %v1227_v33  ;;  %697 = vmatprep.subr.bf16.mxu1 %v1293_v48  ;;  %v1346_v33 = vld [vmem:[#allocation7 + $0x48] sm:$0xff]  }
  0x5f   :  { %v1332_v48 = vld [vmem:[#allocation5 + $0x2d0] ss:$8 sps:$4 sm:$0xff]  }
  0x61   :  { %741 = vmatpush1.bf16.msra.mxu0 %v1229_v34  ;;  %698 = vmatpush1.bf16.msra.mxu1 %v1295_v51  ;;  %v1304_v34 = vld [vmem:[#allocation5 + $0x284] ss:$8 sps:$4 sm:$0xff]   ;;  %v1343_v51 = vld [vmem:[#allocation5 + $0x2f4] ss:$8 sps:$4 sm:$0xff]  }
  0x62   :  { %742 = vmatprep.subr.bf16.mxu0 %v1230_v37  ;;  %699 = vmatprep.subr.bf16.mxu1 %v1299_v52  ;;  %v1348_v37 = vld [vmem:[#allocation7 + $0x50] sm:$0xff]   ;;  %v1341_v52 = vld [vmem:[#allocation5 + $0x2f0] ss:$8 sps:$4 sm:$0xff]  }
  0x65   :  { %743 = vmatpush1.bf16.msra.mxu0 %v1232_v38  ;;  %700 = vmatpush1.bf16.msra.mxu1 %v1301_v56  ;;  %v1310_v38 = vld [vmem:[#allocation5 + $0x294] ss:$8 sps:$4 sm:$0xff]   ;;  %v1351_v56 = vld [vmem:[#allocation7 + $0x18] sm:$0xff]  }
  0x66   :  { %744 = vmatprep.subr.bf16.mxu0 %v1233_v41  ;;  %701 = vmatprep.subr.bf16.mxu1 %v1305_v57  ;;  %v1316_v41 = vld [vmem:[#allocation5 + $0x2a4] ss:$8 sps:$4 sm:$0xff]   ;;  %v1352_v57 = vld [vmem:[#allocation7 + $0x60] sm:$0xff]  }
  0x69   :  { %745 = vmatpush1.bf16.msra.mxu0 %v1235_v42  ;;  %702 = vmatpush1.bf16.msra.mxu1 %v1307_v60  ;;  %v1314_v42 = vld [vmem:[#allocation5 + $0x2a0] ss:$8 sps:$4 sm:$0xff]   ;;  %v1355_v60 = vld [vmem:[#allocation7 + $0x28] sm:$0xff]  }
  0x6a   :  { %746 = vmatprep.subr.bf16.mxu0 %v1236_v45  ;;  %703 = vmatprep.subr.bf16.mxu1 %v1311_v63  ;;  %v1328_v45 = vld [vmem:[#allocation5 + $0x2c4] ss:$8 sps:$4 sm:$0xff]  }
  0x6b   :  { %v1358_v63 = vld [vmem:[#allocation7 + $0x78] sm:$0xff]  }
  0x6d   :  { %747 = vmatpush1.bf16.msra.mxu0 %v1238_v46  ;;  %704 = vmatpush1.bf16.msra.mxu1 %v1313_v2  ;;  %v1326_v46 = vld [vmem:[#allocation5 + $0x2c0] ss:$8 sps:$4 sm:$0xff]  }
  0x6e   :  { %748 = vmatprep.subr.bf16.mxu0 %v1242_v49  ;;  %705 = vmatprep.subr.bf16.mxu1 %v1317_v5  ;;  %v1337_v49 = vld [vmem:[#allocation5 + $0x2e4] ss:$8 sps:$4 sm:$0xff]  }
  0x71   :  { %749 = vmatpush1.bf16.msra.mxu0 %v1244_v50  ;;  %706 = vmatpush1.bf16.msra.mxu1 %v1319_v9  ;;  %v1335_v50 = vld [vmem:[#allocation5 + $0x2e0] ss:$8 sps:$4 sm:$0xff]   ;;  %v175_v9 = vlaneseq }
  0x72   :  { %750 = vmatprep.subr.bf16.mxu0 %v1248_v53  ;;  %707 = vmatprep.subr.bf16.mxu1 %v1323_v10  ;;  %v65_v53 = vld [vmem:[#allocation2 + $0x20] sm:$0xff] }
  0x73   :  { %v176_v10 = vshrl.u32 %v175_v9, 7 }
  0x75   :  { %751 = vmatpush1.bf16.msra.mxu0 %v1250_v54  ;;  %708 = vmatpush1.bf16.msra.mxu1 %v1325_v13  ;;  %v72_v54 = vpack.c.bf16 %v65_v53, %v65_v53  ;;  %v181_v13 = vsub.s32 1, %v176_v10 }
  0x76   :  { %761 = vmatprep.subr.bf16.mxu0 %v1256_v58  ;;  %709 = vmatprep.subr.bf16.mxu1 %v1329_v14  ;;  %v1353_v58 = vld [vmem:[#allocation7 + $0x20] sm:$0xff]  }
  0x78   :  { %753 = vmatmul.mubr.bf16.vlgmr.msra.gmra.mrb[0].mxu0 %v70_v59  ;;  %v1354_v59 = vld [vmem:[#allocation7 + $0x68] sm:$0xff]  }
  0x79   :  { %762 = vmatpush1.bf16.msra.mxu0 %v1254_v62  ;;  %793 = vmatprep.mubr.bf16.mxu0 %v73_v6  ;;  %v1357_v62 = vld [vmem:[#allocation7 + $0x30] sm:$0xff]  }
  0x7a   :  { %763 = vmatprep.subr.bf16.mxu0 %v1262_v1  ;;  %710 = vmatpush1.bf16.msra.mxu1 %v1331_v16 }
  0x7b   :  { %802 = vmatprep.subr.bf16.mxu1 %v1340_v19 }
  0x7d   :  { %764 = vmatpush1.bf16.msra.mxu0 %v1260_v4  ;;  %712 = vmatmul.mubr.bf16.vlgmr.msra.gmra.mrb[0].mxu1 %v68_v21 }
  0x7e   :  { %765 = vmatprep.subr.bf16.mxu0 %v1268_v7  ;;  %803 = vmatpush1.bf16.msra.mxu1 %v1338_v22 }
  0x7f   :  { %834 = vmatprep.mubr.bf16.mxu1 %v1461_v26  ;;  %1156 = vmatprep.subr.bf16.mxu1 %v1344_v24 }
  0x81   :  { %766 = vmatpush1.bf16.msra.mxu0 %v1266_v8 }
  0x82   :  { %767 = vmatprep.subr.bf16.mxu0 %v1274_v11  ;;  %v177_v11 = vsub.s32 0, %v176_v10 }
  0x85   :  { %768 = vmatpush1.bf16.msra.mxu0 %v1272_v12  ;;  %1138 = vmatmul.mubr.msk.bf16.vlgmr.msra.gmra.mrb[4].mxu1 %vm675_vm0, %v74_v30  ;;  %v173_v12 = vld [vmem:[%s1549_s2] sm:$0x3] }
  0x86   :  { %769 = vmatprep.subr.bf16.mxu0 %v1280_v15  ;;  %1157 = vmatpush3.bf16.msra.mxu1 %v1345_v31  ;;  %v178_v14 = vrot.slane %v173_v12, %v177_v11  ;;  %v182_v15 = vrot.slane %v173_v12, %v181_v13  ;;  %v1139_v31 = vld [vmem:[%s1551_s4] ss:$0 sm:$0xff] }
  0x87   :  { %1158 = vmatprep.subr.bf16.mxu1 %v1346_v33 }
  0x89   :  { %770 = vmatpush1.bf16.msra.mxu0 %v1278_v18 }
  0x8a   :  { %771 = vmatprep.subr.bf16.mxu0 %v1286_v20  ;;  %1159 = vmatpush3.bf16.msra.mxu1 %v1347_v35 }
  0x8b   :  { %1160 = vmatprep.subr.bf16.mxu1 %v1348_v37 }
  0x8d   :  { %772 = vmatpush1.bf16.msra.mxu0 %v1284_v23 }
  0x8e   :  { %773 = vmatprep.subr.bf16.mxu0 %v1292_v25  ;;  %1161 = vmatpush3.bf16.msra.mxu1 %v1349_v39 }
  0x8f   :  { %1162 = vmatprep.subr.bf16.mxu1 %v1350_v55 }
  0x91   :  { %774 = vmatpush1.bf16.msra.mxu0 %v1290_v28 }
  0x92   :  { %775 = vmatprep.subr.bf16.mxu0 %v1298_v29  ;;  %1163 = vmatpush3.bf16.msra.mxu1 %v1351_v56 }
  0x93   :  { %1164 = vmatprep.subr.bf16.mxu1 %v1352_v57 }
  0x95   :  { %776 = vmatpush1.bf16.msra.mxu0 %v1296_v32 }
  0x96   :  { %777 = vmatprep.subr.bf16.mxu0 %v1304_v34  ;;  %1165 = vmatpush3.bf16.msra.mxu1 %v1353_v58 }
  0x97   :  { %1166 = vmatprep.subr.bf16.mxu1 %v1354_v59 }
  0x99   :  { %778 = vmatpush1.bf16.msra.mxu0 %v1302_v36 }
  0x9a   :  { %779 = vmatprep.subr.bf16.mxu0 %v1310_v38  ;;  %1167 = vmatpush3.bf16.msra.mxu1 %v1355_v60 }
  0x9b   :  { %1168 = vmatprep.subr.bf16.mxu1 %v1356_v61 }
  0x9d   :  { %780 = vmatpush1.bf16.msra.mxu0 %v1308_v40 }
  0x9e   :  { %781 = vmatprep.subr.bf16.mxu0 %v1316_v41  ;;  %1169 = vmatpush3.bf16.msra.mxu1 %v1357_v62 }
  0x9f   :  { %1170 = vmatprep.subr.bf16.mxu1 %v1358_v63 }
  0xa1   :  { %782 = vmatpush1.bf16.msra.mxu0 %v1314_v42 }
  0xa2   :  { %783 = vmatprep.subr.bf16.mxu0 %v1322_v43  ;;  %1171 = vmatpush3.bf16.msra.mxu1 %v1359_v0 }
  0xa5   :  { %784 = vmatpush1.bf16.msra.mxu0 %v1320_v44 }
  0xa6   :  { %785 = vmatprep.subr.bf16.mxu0 %v1328_v45 }
  0xa9   :  { %786 = vmatpush1.bf16.msra.mxu0 %v1326_v46 }
  0xaa   :  { %787 = vmatprep.subr.bf16.mxu0 %v1334_v47 }
  0xad   :  { %788 = vmatpush1.bf16.msra.mxu0 %v1332_v48 }
  0xae   :  { %789 = vmatprep.subr.bf16.mxu0 %v1337_v49 }
  0xb1   :  { %790 = vmatpush1.bf16.msra.mxu0 %v1335_v50 }
  0xb2   :  { %791 = vmatprep.subr.bf16.mxu0 %v1343_v51 }
  0xb5   :  { %792 = vmatpush1.bf16.msra.mxu0 %v1341_v52 }
  0xb8   :  { %794 = vmatmul.mubr.bf16.vlgmr.msra.gmra.mrb[0].mxu0 %v72_v54 }
 0x150   :  { %v713_v1 = vpop.f32.mrb[0].mxu1 }
 0x151   :  { %v715_v2 = vpop.f32.mrb[1].mxu1  ;;  %v714_v16 = vadd.f32 %v713_v1, %v178_v14 }
 0x152   :  { %v717_v3 = vpop.f32.mrb[2].mxu1  ;;  %v716_v17 = vadd.f32 %v715_v2, %v182_v15 }
 0x153   :  { %v718_v4 = vpop.f32.mrb[3].mxu1 }
 0x158   :  { %v836_v5 = vpop.f32.mrb[4].mxu1 }
 0x159   :  { %v838_v6 = vpop.f32.mrb[5].mxu1 }
 0x15a   :  { %v840_v7 = vpop.f32.mrb[6].mxu1 }
 0x15b   :  { %v841_v8 = vpop.f32.mrb[7].mxu1 }
 0x18b   :  { %v795_v18 = vpop.f32.mrb[0].mxu0 }
 0x18c   :  { %v1179_v19 = vadd.f32 %v795_v18, %v714_v16  ;;  %v797_v20 = vpop.f32.mrb[1].mxu0 }
 0x18d   :  { %v1182_v21 = vadd.f32 %v797_v20, %v716_v17  ;;  %v799_v22 = vpop.f32.mrb[2].mxu0 }
 0x18e   :  { %v1180_v23 = vadd.f32 %v1179_v19, %v836_v5  ;;  %v800_v24 = vpop.f32.mrb[3].mxu0 }
 0x18f   :  { %v1183_v25 = vadd.f32 %v1182_v21, %v838_v6 }
 0x190   :  { %v843_v26 = vmax.f32 %v1180_v23, 0.0 }
 0x191   :  { %v844_v27 = vmax.f32 %v1183_v25, 0.0 }
 0x192   :  { %v845_v29 = vpack.c.bf16 %v843_v26, %v843_v26 }
 0x193   :  { %v846_v28 = vpack.c.bf16 %v844_v27, %v844_v27 }
 0x195   :  { %1014 = vmatprep.mubr.bf16.mxu1 %v846_v28 }
 0x196   :  { %1015 = vmatmul.mubr.bf16.vlgmr.msra.gmra.mrb[8].mxu1 %v845_v29 }
 0x269   :  { %v1172_v30 = vpop.f32.mrb[8].mxu1 }
 0x26a   :  { %v1173_v32 = vpop.f32.mrb[9].mxu1 }
 0x26b   :  { %v1174_v33 = vadd.f32 %v1173_v32, %v1172_v30  ;;  %v1175_v34 = vpop.f32.mrb[10].mxu1 }
 0x26c   :  { %v1176_v35 = vpop.f32.mrb[11].mxu1 }
 0x26d   :  { %v1017_v36 = vadd.f32 %v1174_v33, %v1139_v31 }
 0x26f   :  { %v1022_v37 = vpack.c.bf16 %v1017_v36, %v1017_v36 }
 0x271   :  { %1023 = vst [vmem:[#allocation8] sm:$0xf] %v1022_v37 }
 0x272   :  { %1437 = shalt.err (!%p1434_p0)
}
 0x273   :  { %s1438_s4 = scalar_lea.hbm %s1552_s5, 64 }
 0x274   :  { %p1439_p1 = scmp.ne.s32.totalorder %s1552_s5, %s1438_s4  ;;  %p1442_p2 = scmp.lt.u32.totalorder %s1438_s4, %s1552_s5 }
 0x276   :  { %p1444_p3 = pnand %p1442_p2, %p1439_p1 }
 0x278   :  { %1447 = shalt.err (!%p1444_p3)
}
 0x279   :  { %1033 = dma.vmem_to_hbm [thread:$0]  %s1031_s9, 64, %s1552_s5, [#allocation4]  }
 0x27a   :  { %1452 = dma.done.wait [#allocation4], 64  }
 0x27b   :  { %1453 = vsyncadd [#allocation4], 4294967232 }
 0x27c   :  { %1037 = vsyncpa [#allocation3], 1 }
 0x27d   :  { %1038 = vsyncpa [#allocation6], 1 }
 0x27e   :  { %1039 = vsyncpa [#allocation4], 1 }

</bundles_post_ra>
